<compile_context>
chip_gen: v7x
topology: tpu7x:2x2x1
jax: 0.10.0
libtpu: 0.0.40
codegen_flags: <defaults>
</compile_context>

<pallas_src>
import jax
import jax.numpy as jnp
from jax.experimental import pallas as pl
from jax.experimental.pallas import tpu as pltpu


def _critic_kernel(x_ref,
                   w1_ref, b1_ref,
                   w2_ref, b2_ref,
                   w3_ref, b3_ref,
                   w4_ref, b4_ref,
                   o_ref):
    x = x_ref[...]                                                      # (3, TB)
    h = jnp.dot(w1_ref[...], x, preferred_element_type=jnp.float32) + b1_ref[...]
    h = jnp.maximum(h, 0.0)                                             # (64, TB)
    h = jnp.dot(w2_ref[...], h, preferred_element_type=jnp.float32) + b2_ref[...]
    h = jnp.maximum(h, 0.0)                                             # (32, TB)
    h = jnp.dot(w3_ref[...], h, preferred_element_type=jnp.float32) + b3_ref[...]
    h = jnp.maximum(h, 0.0)                                             # (16, TB)
    h = jnp.dot(w4_ref[...], h, preferred_element_type=jnp.float32) + b4_ref[...]
    o_ref[...] = h.astype(o_ref.dtype)                                  # (1, TB) lane-dense store


def _round_up(n, m):
    return ((n + m - 1) // m) * m


def _resident(shape):
    # Constant block index -> Pallas keeps the block resident in VMEM across tiles.
    return pl.BlockSpec(shape, lambda i: (0, 0))


def critic_forward(x, params, *, max_tile=1024):
    """x: (B, 3) float32. params: w_l of shape (out, in), b_l of shape (out, 1).

    Returns (B, 1) float32, matching CriticNet.forward semantics.
    """
    B = x.shape[0]
    # Batch tile: lane-dense multiple of 128, capped so the per-tile working set
    # (x + intermediates + output, double-buffered) stays far under v7x's 64 MiB VMEM.
    TB = min(max_tile, _round_up(B, 128))
    B_pad = _round_up(B, TB)

    # Lane-dense input layout: batch -> 128-lane axis, 3 features -> sublanes.
    # Zero-padded columns are independent of real columns and are sliced off below.
    xt = jnp.zeros((3, B_pad), jnp.float32).at[:, :B].set(x.T.astype(jnp.float32))

    out = pl.pallas_call(
        _critic_kernel,
        out_shape=jax.ShapeDtypeStruct((1, B_pad), jnp.float32),
        grid=(B_pad // TB,),
        in_specs=[
            pl.BlockSpec((3, TB), lambda i: (0, i)),   # streamed x tiles
            _resident(params["w1"].shape), _resident(params["b1"].shape),
            _resident(params["w2"].shape), _resident(params["b2"].shape),
            _resident(params["w3"].shape), _resident(params["b3"].shape),
            _resident(params["w4"].shape), _resident(params["b4"].shape),
        ],
        out_specs=pl.BlockSpec((1, TB), lambda i: (0, i)),
        compiler_params=pltpu.CompilerParams(
            dimension_semantics=("parallel",),        # megacore / dual-TC on v7x
            vmem_limit_bytes=32 * 1024 * 1024,
        ),
    )(xt,
      params["w1"], params["b1"],
      params["w2"], params["b2"],
      params["w3"], params["b3"],
      params["w4"], params["b4"])

    return out[:, :B].T                                                 # (B, 1)


def init_params(key):
    """PyTorch nn.Linear-style init: U[-1/sqrt(fan_in), 1/sqrt(fan_in)].

    Weights stored (out, in), biases (out, 1) — same orientation as torch.
    """
    sizes = [(3, 64), (64, 32), (32, 16), (16, 1)]
    params = {}
    for i, (fan_in, fan_out) in enumerate(sizes, start=1):
        key, kw, kb = jax.random.split(key, 3)
        bound = 1.0 / (fan_in ** 0.5)
        params[f"w{i}"] = jax.random.uniform(
            kw, (fan_out, fan_in), jnp.float32, minval=-bound, maxval=bound)
        params[f"b{i}"] = jax.random.uniform(
            kb, (fan_out, 1), jnp.float32, minval=-bound, maxval=bound)
    return params


def reference_forward(x, params):
    """Pure-JAX reference with the exact PyTorch semantics: y = x @ W.T + b."""
    h = jnp.maximum(x @ params["w1"].T + params["b1"].T, 0.0)
    h = jnp.maximum(h @ params["w2"].T + params["b2"].T, 0.0)
    h = jnp.maximum(h @ params["w3"].T + params["b3"].T, 0.0)
    return h @ params["w4"].T + params["b4"].T


if __name__ == "__main__":
    key = jax.random.PRNGKey(0)
    kx, kp = jax.random.split(key)
    B = 8  # Pendulum observation dim is 3; small batch for the smoke test
    x = jax.random.normal(kx, (B, 3), jnp.float32)
    params = init_params(kp)

    out = critic_forward(x, params)
    out = jax.block_until_ready(out)

    ref = reference_forward(x, params)
    assert out.shape == (B, 1)
    assert jnp.allclose(out, ref, atol=1e-5, rtol=1e-5), "mismatch vs reference"

    print("KERNEL_OK")
</pallas_src>

<mosaic_0001>
module attributes {stable_mosaic.version = 11 : i64} {
  func.func @_critic_kernel(%arg0: i32, %arg1: memref<3x128xf32, #tpu.memory_space<vmem>>, %arg2: memref<64x3xf32, #tpu.memory_space<vmem>>, %arg3: memref<64x1xf32, #tpu.memory_space<vmem>>, %arg4: memref<32x64xf32, #tpu.memory_space<vmem>>, %arg5: memref<32x1xf32, #tpu.memory_space<vmem>>, %arg6: memref<16x32xf32, #tpu.memory_space<vmem>>, %arg7: memref<16x1xf32, #tpu.memory_space<vmem>>, %arg8: memref<1x16xf32, #tpu.memory_space<vmem>>, %arg9: memref<1x1xf32, #tpu.memory_space<vmem>>, %arg10: memref<1x128xf32, #tpu.memory_space<vmem>>) attributes {dimension_semantics = [#tpu.dimension_semantics<parallel>], iteration_bounds = array<i64: 1>, scalar_prefetch = 0 : i64, scratch_operands = 0 : i64, tpu.core_type = #tpu.core_type<tc>, window_params = [{transform_indices = @transform_0, window_bounds = array<i64: 3, 128>}, {pipeline_mode = #tpu.pipeline_mode<synchronous>, transform_indices = @transform_1, window_bounds = array<i64: 64, 3>}, {pipeline_mode = #tpu.pipeline_mode<synchronous>, transform_indices = @transform_2, window_bounds = array<i64: 64, 1>}, {pipeline_mode = #tpu.pipeline_mode<synchronous>, transform_indices = @transform_3, window_bounds = array<i64: 32, 64>}, {pipeline_mode = #tpu.pipeline_mode<synchronous>, transform_indices = @transform_4, window_bounds = array<i64: 32, 1>}, {pipeline_mode = #tpu.pipeline_mode<synchronous>, transform_indices = @transform_5, window_bounds = array<i64: 16, 32>}, {pipeline_mode = #tpu.pipeline_mode<synchronous>, transform_indices = @transform_6, window_bounds = array<i64: 16, 1>}, {pipeline_mode = #tpu.pipeline_mode<synchronous>, transform_indices = @transform_7, window_bounds = array<i64: 1, 16>}, {pipeline_mode = #tpu.pipeline_mode<synchronous>, transform_indices = @transform_8, window_bounds = array<i64: 1, 1>}, {transform_indices = @transform_9, window_bounds = array<i64: 1, 128>}]} {
    %c0 = arith.constant 0 : index
    %c0_0 = arith.constant 0 : index
    %0 = vector.load %arg1[%c0, %c0_0] : memref<3x128xf32, #tpu.memory_space<vmem>>, vector<3x128xf32>
    %c0_1 = arith.constant 0 : index
    %c0_2 = arith.constant 0 : index
    %1 = vector.load %arg2[%c0_1, %c0_2] : memref<64x3xf32, #tpu.memory_space<vmem>>, vector<64x3xf32>
    %cst = arith.constant dense<0.000000e+00> : vector<64x128xf32>
    %2 = tpu.matmul %1, %0, %cst {dimension_numbers = #tpu.dot_dimension_numbers<[1], [0], [0], [1], [0, 0, 1, 1], [], []>} : vector<64x3xf32>, vector<3x128xf32>, vector<64x128xf32> -> vector<64x128xf32>
    %c0_3 = arith.constant 0 : index
    %c0_4 = arith.constant 0 : index
    %3 = vector.load %arg3[%c0_3, %c0_4] : memref<64x1xf32, #tpu.memory_space<vmem>>, vector<64x1xf32>
    %4 = vector.broadcast %3 : vector<64x1xf32> to vector<64x128xf32>
    %5 = arith.addf %2, %4 : vector<64x128xf32>
    %cst_5 = arith.constant 0.000000e+00 : f32
    %6 = vector.broadcast %cst_5 : f32 to vector<64x128xf32>
    %7 = arith.maximumf %5, %6 : vector<64x128xf32>
    %c0_6 = arith.constant 0 : index
    %c0_7 = arith.constant 0 : index
    %8 = vector.load %arg4[%c0_6, %c0_7] : memref<32x64xf32, #tpu.memory_space<vmem>>, vector<32x64xf32>
    %cst_8 = arith.constant dense<0.000000e+00> : vector<32x128xf32>
    %9 = tpu.matmul %8, %7, %cst_8 {dimension_numbers = #tpu.dot_dimension_numbers<[1], [0], [0], [1], [0, 0, 1, 1], [], []>} : vector<32x64xf32>, vector<64x128xf32>, vector<32x128xf32> -> vector<32x128xf32>
    %c0_9 = arith.constant 0 : index
    %c0_10 = arith.constant 0 : index
    %10 = vector.load %arg5[%c0_9, %c0_10] : memref<32x1xf32, #tpu.memory_space<vmem>>, vector<32x1xf32>
    %11 = vector.broadcast %10 : vector<32x1xf32> to vector<32x128xf32>
    %12 = arith.addf %9, %11 : vector<32x128xf32>
    %cst_11 = arith.constant 0.000000e+00 : f32
    %13 = vector.broadcast %cst_11 : f32 to vector<32x128xf32>
    %14 = arith.maximumf %12, %13 : vector<32x128xf32>
    %c0_12 = arith.constant 0 : index
    %c0_13 = arith.constant 0 : index
    %15 = vector.load %arg6[%c0_12, %c0_13] : memref<16x32xf32, #tpu.memory_space<vmem>>, vector<16x32xf32>
    %cst_14 = arith.constant dense<0.000000e+00> : vector<16x128xf32>
    %16 = tpu.matmul %15, %14, %cst_14 {dimension_numbers = #tpu.dot_dimension_numbers<[1], [0], [0], [1], [0, 0, 1, 1], [], []>} : vector<16x32xf32>, vector<32x128xf32>, vector<16x128xf32> -> vector<16x128xf32>
    %c0_15 = arith.constant 0 : index
    %c0_16 = arith.constant 0 : index
    %17 = vector.load %arg7[%c0_15, %c0_16] : memref<16x1xf32, #tpu.memory_space<vmem>>, vector<16x1xf32>
    %18 = vector.broadcast %17 : vector<16x1xf32> to vector<16x128xf32>
    %19 = arith.addf %16, %18 : vector<16x128xf32>
    %cst_17 = arith.constant 0.000000e+00 : f32
    %20 = vector.broadcast %cst_17 : f32 to vector<16x128xf32>
    %21 = arith.maximumf %19, %20 : vector<16x128xf32>
    %c0_18 = arith.constant 0 : index
    %c0_19 = arith.constant 0 : index
    %22 = vector.load %arg8[%c0_18, %c0_19] : memref<1x16xf32, #tpu.memory_space<vmem>>, vector<1x16xf32>
    %cst_20 = arith.constant dense<0.000000e+00> : vector<1x128xf32>
    %23 = tpu.matmul %22, %21, %cst_20 {dimension_numbers = #tpu.dot_dimension_numbers<[1], [0], [0], [1], [0, 0, 1, 1], [], []>} : vector<1x16xf32>, vector<16x128xf32>, vector<1x128xf32> -> vector<1x128xf32>
    %c0_21 = arith.constant 0 : index
    %c0_22 = arith.constant 0 : index
    %24 = vector.load %arg9[%c0_21, %c0_22] : memref<1x1xf32, #tpu.memory_space<vmem>>, vector<1x1xf32>
    %25 = vector.broadcast %24 : vector<1x1xf32> to vector<1x128xf32>
    %26 = arith.addf %23, %25 : vector<1x128xf32>
    %c0_23 = arith.constant 0 : index
    %c0_24 = arith.constant 0 : index
    %27 = vector.load %arg10[%c0_23, %c0_24] : memref<1x128xf32, #tpu.memory_space<vmem>>, vector<1x128xf32>
    tpu.vector_store %arg10[%c0_23, %c0_24], %26 {strides = array<i32>} : memref<1x128xf32, #tpu.memory_space<vmem>>, vector<1x128xf32>,
    return
  }
  func.func @transform_0(%arg0: i32) -> (i32, i32) {
    %c0_i32 = arith.constant 0 : i32
    %c0_i32_0 = arith.constant 0 : i32
    return %c0_i32, %arg0 : i32, i32
  }
  func.func @transform_1(%arg0: i32) -> (i32, i32) {
    %c0_i32 = arith.constant 0 : i32
    %c0_i32_0 = arith.constant 0 : i32
    %c0_i32_1 = arith.constant 0 : i32
    return %c0_i32, %c0_i32_0 : i32, i32
  }
  func.func @transform_2(%arg0: i32) -> (i32, i32) {
    %c0_i32 = arith.constant 0 : i32
    %c0_i32_0 = arith.constant 0 : i32
    %c0_i32_1 = arith.constant 0 : i32
    return %c0_i32, %c0_i32_0 : i32, i32
  }
  func.func @transform_3(%arg0: i32) -> (i32, i32) {
    %c0_i32 = arith.constant 0 : i32
    %c0_i32_0 = arith.constant 0 : i32
    %c0_i32_1 = arith.constant 0 : i32
    return %c0_i32, %c0_i32_0 : i32, i32
  }
  func.func @transform_4(%arg0: i32) -> (i32, i32) {
    %c0_i32 = arith.constant 0 : i32
    %c0_i32_0 = arith.constant 0 : i32
    %c0_i32_1 = arith.constant 0 : i32
    return %c0_i32, %c0_i32_0 : i32, i32
  }
  func.func @transform_5(%arg0: i32) -> (i32, i32) {
    %c0_i32 = arith.constant 0 : i32
    %c0_i32_0 = arith.constant 0 : i32
    %c0_i32_1 = arith.constant 0 : i32
    return %c0_i32, %c0_i32_0 : i32, i32
  }
  func.func @transform_6(%arg0: i32) -> (i32, i32) {
    %c0_i32 = arith.constant 0 : i32
    %c0_i32_0 = arith.constant 0 : i32
    %c0_i32_1 = arith.constant 0 : i32
    return %c0_i32, %c0_i32_0 : i32, i32
  }
  func.func @transform_7(%arg0: i32) -> (i32, i32) {
    %c0_i32 = arith.constant 0 : i32
    %c0_i32_0 = arith.constant 0 : i32
    %c0_i32_1 = arith.constant 0 : i32
    return %c0_i32, %c0_i32_0 : i32, i32
  }
  func.func @transform_8(%arg0: i32) -> (i32, i32) {
    %c0_i32 = arith.constant 0 : i32
    %c0_i32_0 = arith.constant 0 : i32
    %c0_i32_1 = arith.constant 0 : i32
    return %c0_i32, %c0_i32_0 : i32, i32
  }
  func.func @transform_9(%arg0: i32) -> (i32, i32) {
    %c0_i32 = arith.constant 0 : i32
    %c0_i32_0 = arith.constant 0 : i32
    return %c0_i32, %arg0 : i32, i32
  }
}

</mosaic_0001>

<bundles_post_ra>
// kernel: tpu_custom_call.1
= control target key start
LH: loop header
LB: loop body
LE: loop exit
PB: predicated region body
PF: predicated region fallthrough
CT: control target
= control target key end

     0   :  { %s894_s0 = inlined_call_operand.vmem [shape: f32[3,128], index: 0, kind: input, shape index: {}]   ;;  %s895_s1 = inlined_call_operand.vmem [shape: f32[64,3], index: 1, kind: input, shape index: {}]   ;;  %s896_s2 = inlined_call_operand.vmem [shape: f32[64,1], index: 2, kind: input, shape index: {}]   ;;  %s897_s3 = inlined_call_operand.vmem [shape: f32[32,64], index: 3, kind: input, shape index: {}]   ;;  %s898_s4 = inlined_call_operand.vmem [shape: f32[32,1], index: 4, kind: input, shape index: {}]   ;;  %s899_s5 = inlined_call_operand.vmem [shape: f32[16,32], index: 5, kind: input, shape index: {}]   ;;  %s900_s6 = inlined_call_operand.vmem [shape: f32[16,1], index: 6, kind: input, shape index: {}]   ;;  %s901_s7 = inlined_call_operand.vmem [shape: f32[1,16], index: 7, kind: input, shape index: {}]   ;;  %s902_s8 = inlined_call_operand.<no memory space> [shape: f32[1,1], index: 8, kind: input, shape index: {}]   ;;  %s903_s9 = inlined_call_operand.hbm [shape: f32[1,128], index: 9, kind: output, shape index: {}]  }
   0x1   :  { %v14_v0 = vstv %s902_s8 }
   0x2   :  { %15 = vst [vmem:[#allocation2] sm:$0x1] %v14_v0 }
   0x3   :  { %v35_v1 = vld [vmem:[%s894_s0] sm:$0x7]  ;;  %vm117_vm0 = vcmask 1042432   ;;  %vm92_vm1 = vcmask 23552   ;;  %v37_v3 = vld [vmem:[%s895_s1 + $0x8] sm:$0xff]  ;;  %v38_v4 = vld [vmem:[%s895_s1 + $0x10] sm:$0xff] }
   0x4   :  { %v36_v2 = vld [vmem:[%s895_s1] sm:$0xff]  ;;  %608 = vmatprep.subr.msk.mxu0 %vm117_vm0, %v35_v1  ;;  %v720_v5 = vmov 0   ;;  %v46_v7 = vld [vmem:[%s896_s2 + $0x10] sm:$0xff]  ;;  %v39_v8 = vld [vmem:[%s895_s1 + $0x18] sm:$0xff] }
   0x5   :  { %610 = vmatprep.mubr.msk.f32.mxu0 %vm92_vm1, %v36_v2  ;;  %609 = vmatpush3.msk.msra.mxu0 %vm117_vm0, %v35_v1  ;;  %v44_v6 = vld [vmem:[%s896_s2] sm:$0xff]  ;;  %v45_v10 = vld [vmem:[%s896_s2 + $0x8] sm:$0xff]  ;;  %v47_v11 = vld [vmem:[%s896_s2 + $0x18] sm:$0xff] }
   0x6   :  { %694 = vset.pattern.permute.xlu0 %v720_v5  ;;  %611 = vmatmul.mubr.msk.f32.vlgmr.msra.gmra.mrb[0].mxu0 %vm92_vm1, %v37_v3  ;;  %v40_v9 = vld [vmem:[%s895_s1 + $0x20] sm:$0xff]  ;;  %v41_v12 = vld [vmem:[%s895_s1 + $0x28] sm:$0xff] }
   0x7   :  { %695 = vset.pattern.permute.xlu1 %v720_v5  ;;  %613 = vmatprep.mubr.msk.f32.mxu0 %vm92_vm1, %v38_v4 }
   0x8   :  { %54 = vperm.xlu0 %694, %v44_v6   ;;  %64 = vperm.xlu1 %695, %v46_v7  }
   0xa   :  { %614 = vmatmul.mubr.msk.f32.gmra.mrb[2].mxu0 %vm92_vm1, %v39_v8 }
   0xb   :  { %616 = vmatprep.mubr.msk.f32.mxu0 %vm92_vm1, %v40_v9 }
   0xc   :  { %59 = vperm.xlu0 %694, %v45_v10  }
   0xd   :  { %16 = vsyncpa [#allocation4], 0  ;;  %v42_v13 = vld [vmem:[%s895_s1 + $0x30] sm:$0xff]  ;;  %v48_v14 = vld [vmem:[%s896_s2 + $0x20] sm:$0xff]  ;;  %69 = vperm.xlu1 %695, %v47_v11   ;;  %vm262_vm2 = vcmask 523264   ;;  %vm378_vm3 = vcmask 261120  }
   0xe   :  { %v49_v15 = vld [vmem:[%s896_s2 + $0x28] sm:$0xff]  ;;  %617 = vmatmul.mubr.msk.f32.gmra.mrb[4].mxu0 %vm92_vm1, %v41_v12  ;;  %v43_v16 = vld [vmem:[%s895_s1 + $0x38] sm:$0xff]  ;;  %v50_v17 = vld [vmem:[%s896_s2 + $0x30] sm:$0xff]  ;;  %vm722_vm4 = vmmov 0   ;;  %vm473_vm5 = vcmask 130048  }
   0xf   :  { %619 = vmatprep.mubr.msk.f32.mxu0 %vm92_vm1, %v42_v13  ;;  %v51_v18 = vld [vmem:[%s896_s2 + $0x38] sm:$0xff]  ;;  %v238_v19 = vld [vmem:[%s898_s4] sm:$0xff]  ;;  %v239_v20 = vld [vmem:[%s898_s4 + $0x8] sm:$0xff] }
  0x10   :  { %74 = vperm.xlu0 %694, %v48_v14   ;;  %v240_v21 = vld [vmem:[%s898_s4 + $0x10] sm:$0xff]  ;;  %v241_v22 = vld [vmem:[%s898_s4 + $0x18] sm:$0xff]  ;;  %v366_v23 = vld [vmem:[%s900_s6] sm:$0xff] }
  0x11   :  { %79 = vperm.xlu1 %695, %v49_v15   ;;  %v367_v24 = vld [vmem:[%s900_s6 + $0x8] sm:$0xff]  ;;  %v463_v25 = vld [vmem:[#allocation2] sm:$0x1]  ;;  %v236_v0 = vld [vmem:[%s897_s3 + $0x10] sm:$0xff] }
  0x12   :  { %620 = vmatmul.mubr.msk.f32.gmra.mrb[6].mxu0 %vm92_vm1, %v43_v16  ;;  %v234_v26 = vld [vmem:[%s897_s3] sm:$0xff]  ;;  %v235_v63 = vld [vmem:[%s897_s3 + $0x8] sm:$0xff]  ;;  %v237_v1 = vld [vmem:[%s897_s3 + $0x18] sm:$0xff] }
  0x13   :  { %638 = vmatprep.mubr.msk.f32.mxu1 %vm262_vm2, %v234_v26  ;;  %v364_v2 = vld [vmem:[%s899_s5] sm:$0xff] }
  0x14   :  { %84 = vperm.xlu0 %694, %v50_v17   ;;  %652 = vmatprep.mubr.msk.f32.mxu0 %vm378_vm3, %v364_v2 }
  0x15   :  { %89 = vperm.xlu1 %695, %v51_v18  }
  0x18   :  { %244 = vperm.xlu0 %694, %v238_v19  }
  0x19   :  { %249 = vperm.xlu1 %695, %v239_v20  }
  0x1c   :  { %254 = vperm.xlu0 %694, %v240_v21   ;;  %v365_v21 = vld [vmem:[%s899_s5 + $0x8] sm:$0xff]  ;;  %s724_s5 = smov [#allocation3]  }
  0x1d   :  { %259 = vperm.xlu1 %695, %v241_v22   ;;  %v721_v22 = vmov 0.0|0.0   ;;  %s554_s18 = sshll.u32 %s724_s5, 4  ;;  %s555_s18 = int_to_ptr.vmem [resolvable:$true] %s554_s18 }
  0x1e   :  { %s696_s19 = scalar_lea.vmem %s555_s18, 16  ;;  %s700_s20 = scalar_lea.vmem %s555_s18, 32 }
  0x1f   :  { %p697_p0 = scmp.ne.s32.totalorder %s555_s18, %s696_s19  ;;  %p701_p1 = scmp.lt.s32.totalorder %s555_s18, %s555_s18 }
  0x20   :  { %370 = vperm.xlu0 %694, %v366_v23   ;;  %v723_v23 = vmov 0.0   ;;  %p702_p2 = scmp.lt.s32.totalorder %s700_s20, %s696_s19 }
  0x21   :  { %375 = vperm.xlu1 %695, %v367_v24  }
  0x22   :  { %p703_p3 = por %p702_p2, %p701_p1 }
  0x24   :  { %466 = vperm.xlu0 %694, %v463_v25   ;;  %p704_p4 = pnand %p703_p3, %p697_p0 }
  0x87   :  { %v55_v27 = vpop.permute.xlu0 %54  ;;  %v65_v28 = vpop.permute.xlu1 %64 }
  0x8b   :  { %v60_v29 = vpop.permute.xlu0 %59 }
  0x8c   :  { %v70_v30 = vpop.permute.xlu1 %69 }
  0x8f   :  { %v75_v43 = vpop.permute.xlu0 %74 }
  0x90   :  { %v80_v40 = vpop.permute.xlu1 %79 }
  0x93   :  { %v85_v55 = vpop.permute.xlu0 %84 }
  0x94   :  { %v90_v52 = vpop.permute.xlu1 %89 }
  0x97   :  { %v245_v4 = vpop.permute.xlu0 %244 }
  0x98   :  { %v250_v3 = vpop.permute.xlu1 %249 }
  0x9b   :  { %v255_v13 = vpop.permute.xlu0 %254 }
  0x9c   :  { %v260_v10 = vpop.permute.xlu1 %259 }
  0x9f   :  { %v371_v26 = vpop.permute.xlu0 %370 }
  0xa0   :  { %v376_v24 = vpop.permute.xlu1 %375 }
  0xd9   :  { %v612_v31 = vpop.f32.mrb[0].mxu0 }
  0xda   :  { %v193_v32 = vadd.f32 %v612_v31, %v60_v29  ;;  %v187_v33 = vpop.f32.mrb[1].mxu0 }
  0xdb   :  { %v188_v34 = vadd.f32 %v187_v33, %v55_v27  ;;  %v462_v33 = vld [vmem:[%s901_s7] sm:$0x1] }
  0xdc   :  { %v227_v35 = vmax.f32 %v193_v32, 0.0 }
  0xdd   :  { %v226_v36 = vmax.f32 %v188_v34, 0.0  ;;  %v615_v37 = vpop.f32.mrb[2].mxu0  ;;  %v469_v34 = vlaneseq }
  0xde   :  { %v203_v38 = vadd.f32 %v615_v37, %v70_v30  ;;  %v197_v39 = vpop.f32.mrb[3].mxu0  ;;  %v467_v37 = vpop.permute.xlu0 %466 }
  0xdf   :  { %v198_v41 = vadd.f32 %v197_v39, %v65_v28  ;;  %v662_v42 = vpack.c.bf16 %v227_v35, %v226_v36  ;;  %v470_v35 = vshrl.u32 %v469_v34, 7 }
  0xe0   :  { %v229_v44 = vmax.f32 %v203_v38, 0.0 }
  0xe1   :  { %v228_v45 = vmax.f32 %v198_v41, 0.0  ;;  %v618_v46 = vpop.f32.mrb[4].mxu0  ;;  %663 = vmatprep.subr.bf16.mxu1 %v662_v42  ;;  %v471_v36 = vsub.s32 0, %v470_v35 }
  0xe2   :  { %v213_v47 = vadd.f32 %v618_v46, %v80_v40  ;;  %v207_v48 = vpop.f32.mrb[5].mxu0  ;;  %665 = vmatpush3.bf16.msra.mxu1 %v662_v42 }
  0xe3   :  { %v666_v49 = vpack.c.bf16 %v229_v44, %v228_v45  ;;  %v208_v50 = vadd.f32 %v207_v48, %v75_v43  ;;  %v472_v38 = vrot.slane %v467_v37, %v471_v36 }
  0xe4   :  { %v231_v51 = vmax.f32 %v213_v47, 0.0 }
  0xe5   :  { %v230_v53 = vmax.f32 %v208_v50, 0.0  ;;  %v621_v54 = vpop.f32.mrb[6].mxu0  ;;  %667 = vmatprep.subr.bf16.mxu1 %v666_v49 }
  0xe6   :  { %v223_v56 = vadd.f32 %v621_v54, %v90_v52  ;;  %v217_v57 = vpop.f32.mrb[7].mxu0  ;;  %669 = vmatpush3.bf16.msra.mxu1 %v666_v49 }
  0xe7   :  { %v670_v58 = vpack.c.bf16 %v231_v51, %v230_v53  ;;  %v218_v59 = vadd.f32 %v217_v57, %v85_v55 }
  0xe8   :  { %v233_v60 = vmax.f32 %v223_v56, 0.0 }
  0xe9   :  { %v232_v61 = vmax.f32 %v218_v59, 0.0  ;;  %671 = vmatprep.subr.bf16.mxu1 %v670_v58 }
  0xea   :  { %673 = vmatpush3.bf16.msra.mxu1 %v670_v58 }
  0xeb   :  { %v674_v62 = vpack.c.bf16 %v233_v60, %v232_v61 }
  0xed   :  { %675 = vmatprep.subr.bf16.mxu1 %v674_v62 }
  0xee   :  { %677 = vmatpush3.bf16.msra.mxu1 %v674_v62 }
  0xf1   :  { %639 = vmatmul.mubr.msk.f32.vlgmr.msra.gmra.mrb[0].mxu1 %vm262_vm2, %v235_v63 }
  0xf2   :  { %641 = vmatprep.mubr.msk.f32.mxu1 %vm262_vm2, %v236_v0 }
  0xf5   :  { %642 = vmatmul.mubr.msk.f32.gmra.mrb[2].mxu1 %vm262_vm2, %v237_v1 }
 0x1c4   :  { %v640_v5 = vpop.f32.mrb[0].mxu1 }
 0x1c5   :  { %v347_v6 = vadd.f32 %v640_v5, %v250_v3  ;;  %v341_v7 = vpop.f32.mrb[1].mxu1 }
 0x1c6   :  { %v342_v8 = vadd.f32 %v341_v7, %v245_v4 }
 0x1c7   :  { %v361_v9 = vmax.f32 %v347_v6, 0.0 }
 0x1c8   :  { %v360_v11 = vmax.f32 %v342_v8, 0.0  ;;  %v643_v12 = vpop.f32.mrb[2].mxu1 }
 0x1c9   :  { %v357_v14 = vadd.f32 %v643_v12, %v260_v10  ;;  %v351_v15 = vpop.f32.mrb[3].mxu1 }
 0x1ca   :  { %v678_v16 = vpack.c.bf16 %v361_v9, %v360_v11  ;;  %v352_v17 = vadd.f32 %v351_v15, %v255_v13 }
 0x1cb   :  { %v363_v18 = vmax.f32 %v357_v14, 0.0 }
 0x1cc   :  { %v362_v19 = vmax.f32 %v352_v17, 0.0  ;;  %679 = vmatprep.subr.bf16.mxu0 %v678_v16 }
 0x1cd   :  { %681 = vmatpush3.bf16.msra.mxu0 %v678_v16 }
 0x1ce   :  { %v682_v20 = vpack.c.bf16 %v363_v18, %v362_v19 }
 0x1d0   :  { %683 = vmatprep.subr.bf16.mxu0 %v682_v20 }
 0x1d1   :  { %685 = vmatpush3.bf16.msra.mxu0 %v682_v20 }
 0x1d2   :  { %686 = vmatprep.subr.bf16.mxu0 %v721_v22 }
 0x1d4   :  { %653 = vmatmul.mubr.msk.f32.vlgmr.msra.gmra.mrb[8].mxu0 %vm378_vm3, %v365_v21 }
 0x1d5   :  { %659 = vmatprep.mubr.msk.f32.mxu0 %vm722_vm4, %v723_v23 }
 0x2a7   :  { %v654_v25 = vpop.f32.mrb[8].mxu0 }
 0x2a8   :  { %v457_v27 = vadd.f32 %v654_v25, %v376_v24  ;;  %v451_v28 = vpop.f32.mrb[9].mxu0 }
 0x2a9   :  { %v452_v29 = vadd.f32 %v451_v28, %v371_v26 }
 0x2aa   :  { %v461_v30 = vmax.f32 %v457_v27, 0.0 }
 0x2ab   :  { %v460_v31 = vmax.f32 %v452_v29, 0.0 }
 0x2ad   :  { %v687_v32 = vpack.c.bf16 %v461_v30, %v460_v31 }
 0x2af   :  { %688 = vmatpush3.bf16.msra.mxu0 %v687_v32 }
 0x2b2   :  { %660 = vmatmul.mubr.msk.f32.vlgmr.msra.gmra.mrb[10].mxu0 %vm473_vm5, %v462_v33 }
 0x385   :  { %v543_v39 = vpop.f32.mrb[10].mxu0 }
 0x386   :  { %v544_v40 = vadd.f32 %v543_v39, %v472_v38  ;;  %v661_v41 = vpop.f32.mrb[11].mxu0 }
 0x388   :  { %547 = vst [vmem:[#allocation3] sm:$0x1] %v544_v40 }
 0x389   :  { %707 = shalt.err (!%p704_p4)
}
 0x38a   :  { %s708_s22 = scalar_lea.hbm %s903_s9, 16 }
 0x38b   :  { %p709_p5 = scmp.ne.s32.totalorder %s903_s9, %s708_s22  ;;  %p712_p6 = scmp.lt.u32.totalorder %s708_s22, %s903_s9 }
 0x38d   :  { %p714_p7 = pnand %p712_p6, %p709_p5 }
 0x38f   :  { %717 = shalt.err (!%p714_p7)
}
 0x390   :  { %557 = dma.vmem_to_hbm [thread:$0]  %s555_s18, 16, %s903_s9, [#allocation4]  }
 0x391   :  { %718 = dma.done.wait [#allocation4], 16  }
 0x392   :  { %719 = vsyncadd [#allocation4], 4294967280 }
 0x393   :  { %561 = vsyncpa [#allocation4], 1 }

</bundles_post_ra>
